<compile_context>
chip_gen: v5e
topology: v5e:2x2
jax: 0.10.0
libtpu: 0.0.40
codegen_flags: <defaults>
</compile_context>

<pallas_src>
import functools
import math

import jax
import jax.numpy as jnp
from jax.experimental import pallas as pl
from jax.experimental.pallas import tpu as pltpu

TM_MAX = 512    # max row tile of the fused matmul kernel
TK_MAX = 2048   # max K (reduction) tile per grid step
TM_EW = 1024    # max row tile of the elementwise kernels


def _round_up(x, m):
    return (x + m - 1) // m * m


def _pick_divisor_tile(total, max_tile):
    """Largest multiple of 128 dividing `total` (itself a multiple of 128), <= max_tile."""
    nb = total // 128
    best = 1
    for d in range(1, nb + 1):
        if nb % d == 0 and d * 128 <= max_tile:
            best = d
    return best * 128


@functools.lru_cache(maxsize=None)
def _vmem_limit_bytes():
    # Generation-aware VMEM budget: v7x only has 64 MiB / TensorCore.
    try:
        cap = int(getattr(pltpu.get_tpu_info(), "vmem_capacity_bytes",
                          64 * 1024 * 1024))
    except Exception:
        cap = 64 * 1024 * 1024
    return min(cap * 3 // 4, 96 * 1024 * 1024)


def _compiler_params(semantics):
    return pltpu.CompilerParams(
        dimension_semantics=semantics,
        vmem_limit_bytes=_vmem_limit_bytes(),
    )


def _row_tile(m, lane_width, bytes_per_row_unit=4, target_bytes=4 << 20):
    """Row tile for mem-bound elementwise kernels: big, but capped by a VMEM budget."""
    cap = max(8, (target_bytes // max(1, lane_width * bytes_per_row_unit)) // 8 * 8)
    return min(TM_EW, cap, _round_up(m, 8))


def _apply_act(y, act):
    if act == "relu":
        return jnp.maximum(y, 0.0)
    if act == "sigmoid":
        return jax.nn.sigmoid(y)
    return y


# ----------------------------------------------------------------------------
# Fused (bf16 matmul -> f32 acc -> +bias [+residual] -> activation) kernel
# ----------------------------------------------------------------------------
def _fused_mm_kernel(*refs, act, has_res):
    if has_res:
        x_ref, w_ref, b_ref, r_ref, o_ref, acc_ref = refs
    else:
        x_ref, w_ref, b_ref, o_ref, acc_ref = refs
    kk = pl.program_id(2)

    @pl.when(kk == 0)
    def _():
        acc_ref[...] = jnp.zeros_like(acc_ref)

    acc_ref[...] += jnp.dot(x_ref[...], w_ref[...],
                            preferred_element_type=jnp.float32)

    @pl.when(kk == pl.num_programs(2) - 1)
    def _():
        y = acc_ref[...] + b_ref[...]
        if has_res:
            y = y + r_ref[...]
        o_ref[...] = _apply_act(y, act)


def fused_matmul(x, wp, bp, nout, residual=None, act="none"):
    """out[:, :nout] = act(x @ wp + bp [+ residual]).

    x        : [M, K]   (any float dtype; cast to bf16 here)
    wp       : [Kp, Np] bf16 weight, already reshaped/padded with BN scale folded in
    bp       : [1, Np]  f32 bias / folded BN shift
    residual : optional [M, nout] f32, added in the f32 accumulator path
    """
    M, K = x.shape
    Kp, Np = wp.shape
    tm = min(TM_MAX, _round_up(M, 8))          # no 128-row padding of tiny-M layers
    Mp = _round_up(M, tm)
    tk = _pick_divisor_tile(Kp, TK_MAX)        # K reduction axis for big weights
    tn = 256 if Np % 256 == 0 else 128         # lane-dense outputs; splits N>=512

    xp = jnp.pad(x.astype(jnp.bfloat16), ((0, Mp - M), (0, Kp - K)))
    args = [xp, wp, bp]
    in_specs = [
        pl.BlockSpec((tm, tk), lambda i, j, k: (i, k)),
        pl.BlockSpec((tk, tn), lambda i, j, k: (k, j)),
        pl.BlockSpec((1, tn), lambda i, j, k: (0, j)),
    ]
    has_res = residual is not None
    if has_res:
        rp = jnp.pad(residual.astype(jnp.float32),
                     ((0, Mp - M), (0, Np - nout)))
        args.append(rp)
        in_specs.append(pl.BlockSpec((tm, tn), lambda i, j, k: (i, j)))

    out = pl.pallas_call(
        functools.partial(_fused_mm_kernel, act=act, has_res=has_res),
        out_shape=jax.ShapeDtypeStruct((Mp, Np), jnp.float32),
        grid=(Mp // tm, Np // tn, Kp // tk),
        in_specs=in_specs,
        out_specs=pl.BlockSpec((tm, tn), lambda i, j, k: (i, j)),
        scratch_shapes=[pltpu.VMEM((tm, tn), jnp.float32)],
        compiler_params=_compiler_params(("parallel", "parallel", "arbitrary")),
    )(*args)
    return out[:M, :nout]


# ----------------------------------------------------------------------------
# Conv wrappers (im2col glue in bf16 + fused matmul kernel)
# ----------------------------------------------------------------------------
def _im2col(x, kh, kw, stride, pad, dilation=1):
    # TODO(synk): im2col is XLA glue (a bf16 kh*kw-expanded buffer); a fully fused
    # tap-loop conv kernel would remove this HBM materialization entirely.
    n, h, w_, c = x.shape
    xp = jnp.pad(x, ((0, 0), (pad, pad), (pad, pad), (0, 0)))
    ho = (h + 2 * pad - dilation * (kh - 1) - 1) // stride + 1
    wo = (w_ + 2 * pad - dilation * (kw - 1) - 1) // stride + 1
    cols = []
    for i in range(kh):
        for j in range(kw):
            cols.append(
                xp[:, i * dilation:i * dilation + stride * (ho - 1) + 1:stride,
                      j * dilation:j * dilation + stride * (wo - 1) + 1:stride, :])
    pat = jnp.stack(cols, axis=3)  # [N, Ho, Wo, kh*kw, C]
    return pat.reshape(n * ho * wo, kh * kw * c), (n, ho, wo)


def conv2d(x, cp, stride=1, pad=0, dilation=1, residual=None, act="none"):
    cols, (n, ho, wo) = _im2col(x.astype(jnp.bfloat16), cp["kh"], cp["kw"],
                                stride, pad, dilation)
    res2d = None if residual is None else residual.reshape(n * ho * wo, cp["cout"])
    y = fused_matmul(cols, cp["w"], cp["b"], cp["cout"], residual=res2d, act=act)
    return y.reshape(n, ho, wo, cp["cout"])


def conv_transpose2d_s2(x, dp, act="none"):
    """Stride-2 ConvTranspose2d as 4 sub-pixel phase convolutions (no zero-padding FLOPs)."""
    # TODO(synk): the spatial kernel flip of ConvTranspose2d is assumed folded into the
    # synthetic weight init; loading real pretrained deconv weights would require the flip.
    n, h, w_, _ = x.shape
    cout = dp["phases"][0]["conv"]["cout"]
    outs = []
    for ph in dp["phases"]:
        plh, phh = ph["pad_h"]
        plw, phw = ph["pad_w"]
        xp = jnp.pad(x, ((0, 0), (plh, phh), (plw, phw), (0, 0)))
        outs.append(conv2d(xp, ph["conv"], stride=1, pad=0, act=act))
    p00, p01, p10, p11 = outs
    top = jnp.stack([p00, p01], axis=3)   # [N, H, W, 2, C]
    bot = jnp.stack([p10, p11], axis=3)
    full = jnp.stack([top, bot], axis=2)  # [N, H, 2, W, 2, C]
    return full.reshape(n, 2 * h, 2 * w_, cout)


# ----------------------------------------------------------------------------
# MaxPool 3x3 / stride 2 / pad 1 kernel
# ----------------------------------------------------------------------------
def _maxpool_kernel(p_ref, o_ref):
    o_ref[...] = jnp.max(p_ref[...], axis=0)


def maxpool_3x3_s2_p1(x):
    n, h, w_, c = x.shape
    xp = jnp.pad(x, ((0, 0), (1, 1), (1, 1), (0, 0)), constant_values=-jnp.inf)
    ho = (h + 2 - 3) // 2 + 1
    wo = (w_ + 2 - 3) // 2 + 1
    cols = [xp[:, i:i + 2 * (ho - 1) + 1:2, j:j + 2 * (wo - 1) + 1:2, :]
            for i in range(3) for j in range(3)]
    pat = jnp.stack(cols, axis=0)  # [9, N, Ho, Wo, C]
    if (wo * c) % 128 == 0 and (n * ho) % 8 == 0:
        m, k = n * ho, wo * c                       # lane-dense reshape, no channel pad
        pat = pat.reshape(9, m, k)
        crop = None
    else:
        m, k = n * ho * wo, _round_up(c, 128)
        pat = jnp.pad(pat.reshape(9, -1, c), ((0, 0), (0, 0), (0, k - c)),
                      constant_values=-jnp.inf)
        crop = c
    tm = _row_tile(m, k, bytes_per_row_unit=4 * 10)
    mp = _round_up(m, tm)
    if mp != m:
        pat = jnp.pad(pat, ((0, 0), (0, mp - m), (0, 0)), constant_values=-jnp.inf)
    out = pl.pallas_call(
        _maxpool_kernel,
        out_shape=jax.ShapeDtypeStruct((mp, k), jnp.float32),
        grid=(mp // tm,),
        in_specs=[pl.BlockSpec((9, tm, k), lambda i: (0, i, 0))],
        out_specs=pl.BlockSpec((tm, k), lambda i: (i, 0)),
        compiler_params=_compiler_params(("parallel",)),
    )(pat)
    out = out[:m]
    if crop is not None:
        out = out[:, :crop]
    return out.reshape(n, ho, wo, c)


# ----------------------------------------------------------------------------
# Global average pool kernel (for FFM attention):  NHWC -> [N, C]
# ----------------------------------------------------------------------------
def _gap_kernel(x_ref, o_ref, *, inv_hw):
    o_ref[...] = jnp.sum(x_ref[...], axis=1) * inv_hw


def global_avg_pool(x):
    n, h, w_, c = x.shape
    hw = h * w_
    hwp = _round_up(hw, 8)
    cp = _round_up(c, 128)
    x3 = jnp.pad(x.reshape(n, hw, c), ((0, 0), (0, hwp - hw), (0, cp - c)))
    out = pl.pallas_call(
        functools.partial(_gap_kernel, inv_hw=1.0 / hw),
        out_shape=jax.ShapeDtypeStruct((n, cp), jnp.float32),
        grid=(1,),
        in_specs=[pl.BlockSpec((n, hwp, cp), lambda i: (0, 0, 0))],
        out_specs=pl.BlockSpec((n, cp), lambda i: (0, 0)),
        compiler_params=_compiler_params(("arbitrary",)),
    )(x3)
    return out[:, :c]


# ----------------------------------------------------------------------------
# FFM combine kernel: feat * atten + feat, atten broadcast per-batch inside the kernel
# ----------------------------------------------------------------------------
def _ffm_kernel(f_ref, a_ref, o_ref):
    f = f_ref[...]
    o_ref[...] = f * a_ref[...] + f


def ffm_scale_fma(feat, atten):
    n, h, w_, c = feat.shape
    hw = h * w_
    cp = _round_up(c, 128)
    f3 = jnp.pad(feat.reshape(n, hw, c), ((0, 0), (0, 0), (0, cp - c)))
    a3 = jnp.pad(atten, ((0, 0), (0, cp - c))).reshape(n, 1, cp)
    out = pl.pallas_call(
        _ffm_kernel,
        out_shape=jax.ShapeDtypeStruct((n, hw, cp), jnp.float32),
        grid=(n,),
        in_specs=[pl.BlockSpec((1, hw, cp), lambda i: (i, 0, 0)),
                  pl.BlockSpec((1, 1, cp), lambda i: (i, 0, 0))],
        out_specs=pl.BlockSpec((1, hw, cp), lambda i: (i, 0, 0)),
        compiler_params=_compiler_params(("parallel",)),
    )(f3, a3)
    return out[:, :, :c].reshape(n, h, w_, c)


# ----------------------------------------------------------------------------
# Residual / edge add kernel
# ----------------------------------------------------------------------------
def _add_kernel(x_ref, y_ref, o_ref):
    o_ref[...] = x_ref[...] + y_ref[...]


def elementwise_add(x, y):
    n, h, w_, c = x.shape
    if (w_ * c) % 128 == 0 and (n * h) % 8 == 0:
        m, k = n * h, w_ * c                         # lane-dense reshape, no padding
        xf, yf = x.reshape(m, k), y.reshape(m, k)
        crop = None
    else:
        m, k = n * h * w_, _round_up(c, 128)
        xf = jnp.pad(x.reshape(-1, c), ((0, 0), (0, k - c)))
        yf = jnp.pad(y.reshape(-1, c), ((0, 0), (0, k - c)))
        crop = c
    tm = _row_tile(m, k, bytes_per_row_unit=4 * 3)
    mp = _round_up(m, tm)
    if mp != m:
        xf = jnp.pad(xf, ((0, mp - m), (0, 0)))
        yf = jnp.pad(yf, ((0, mp - m), (0, 0)))
    out = pl.pallas_call(
        _add_kernel,
        out_shape=jax.ShapeDtypeStruct((mp, k), jnp.float32),
        grid=(mp // tm,),
        in_specs=[pl.BlockSpec((tm, k), lambda i: (i, 0)),
                  pl.BlockSpec((tm, k), lambda i: (i, 0))],
        out_specs=pl.BlockSpec((tm, k), lambda i: (i, 0)),
        compiler_params=_compiler_params(("parallel",)),
    )(xf, yf)
    out = out[:m]
    if crop is not None:
        out = out[:, :crop]
    return out.reshape(n, h, w_, c)


# ----------------------------------------------------------------------------
# Parameter construction: weights are stored in matmul-ready (padded, bf16,
# BN-scale-folded) form so the per-forward path only touches activations.
# ----------------------------------------------------------------------------
class KeyGen:
    def __init__(self, seed):
        self._key = jax.random.PRNGKey(seed)

    def __call__(self):
        self._key, sub = jax.random.split(self._key)
        return sub


def init_conv_w(key, kh, kw, cin, cout):
    std = math.sqrt(2.0 / (kh * kw * cin))
    return std * jax.random.normal(key, (kh, kw, cin, cout), dtype=jnp.float32)


def init_bn(key, c):
    k1, k2, k3, k4 = jax.random.split(key, 4)
    gamma = 1.0 + 0.1 * jax.random.normal(k1, (c,), dtype=jnp.float32)
    beta = 0.1 * jax.random.normal(k2, (c,), dtype=jnp.float32)
    mean = 0.1 * jax.random.normal(k3, (c,), dtype=jnp.float32)
    var = 1.0 + 0.1 * jnp.abs(jax.random.normal(k4, (c,), dtype=jnp.float32))
    scale = gamma / jnp.sqrt(var + 1e-5)
    shift = beta - mean * scale
    return scale, shift


def init_bias(key, c):
    return 0.01 * jax.random.normal(key, (c,), dtype=jnp.float32)


def prep_conv(w_hwio, scale, shift):
    """HWIO weight + per-channel scale/shift -> padded bf16 matmul operand + f32 bias."""
    kh, kw, cin, cout = w_hwio.shape
    K = kh * kw * cin
    w2d = w_hwio.reshape(K, cout) * scale[None, :]          # fold BN scale into weight
    Kp = _round_up(K, 128)
    Np = _round_up(cout, 128)
    wp = jnp.pad(w2d, ((0, Kp - K), (0, Np - cout))).astype(jnp.bfloat16)
    bp = jnp.pad(shift.astype(jnp.float32), (0, Np - cout)).reshape(1, Np)
    return {"w": wp, "b": bp, "kh": kh, "kw": kw, "cin": cin, "cout": cout}


def _phase_taps(k, lo, a):
    return [(u, (u + a - lo) // 2) for u in range(k) if (u + a - lo) % 2 == 0]


def prep_deconv_s2(w_hwio, scale, shift, pad, out_pad):
    """Sub-pixel decomposition of a stride-2 ConvTranspose2d into 4 small stride-1 convs."""
    k = w_hwio.shape[0]
    assert k - 2 - 2 * pad + out_pad == 0, "only exact-2x stride-2 deconvs supported"
    lo = k - 1 - pad
    phases = []
    for a in range(2):
        for b in range(2):
            th = _phase_taps(k, lo, a)
            tw = _phase_taps(k, lo, b)
            dh0 = min(d for _, d in th); dh1 = max(d for _, d in th)
            dw0 = min(d for _, d in tw); dw1 = max(d for _, d in tw)
            assert dh0 <= 0 and dw0 <= 0
            sub = jnp.zeros((dh1 - dh0 + 1, dw1 - dw0 + 1) + w_hwio.shape[2:],
                            jnp.float32)
            for uh, dh in th:
                for uw, dw in tw:
                    sub = sub.at[dh - dh0, dw - dw0].set(w_hwio[uh, uw])
            phases.append({
                "conv": prep_conv(sub, scale, shift),
                "pad_h": (-dh0, max(0, dh1)),
                "pad_w": (-dw0, max(0, dw1)),
            })
    return {"phases": phases}


def make_params(seed=0, out_channels=2):
    kg = KeyGen(seed)
    filters = [64, 128, 256, 512]

    def conv_bn(kh, kw, cin, cout):
        w = init_conv_w(kg(), kh, kw, cin, cout)
        scale, shift = init_bn(kg(), cout)
        return prep_conv(w, scale, shift)

    def conv_bias(kh, kw, cin, cout):
        w = init_conv_w(kg(), kh, kw, cin, cout)
        b = init_bias(kg(), cout)
        return prep_conv(w, jnp.ones((cout,), jnp.float32), b)

    def deconv_bn(k, cin, cout, pad, out_pad):
        w = init_conv_w(kg(), k, k, cin, cout)
        scale, shift = init_bn(kg(), cout)
        return prep_deconv_s2(w, scale, shift, pad, out_pad)

    def deconv_bias(k, cin, cout, pad, out_pad):
        w = init_conv_w(kg(), k, k, cin, cout)
        b = init_bias(kg(), cout)
        return prep_deconv_s2(w, jnp.ones((cout,), jnp.float32), b, pad, out_pad)

    p = {}
    # TODO(synk): original loads pretrained resnet34 weights from a .pth file; synthetic init here.
    p["firstconv"] = conv_bn(7, 7, 3, 64)

    def basic_block(cin, cout, stride):
        blk = {"stride": stride,
               "conv1": conv_bn(3, 3, cin, cout),
               "conv2": conv_bn(3, 3, cout, cout)}
        if stride != 1 or cin != cout:
            blk["down"] = conv_bn(1, 1, cin, cout)
        return blk

    def make_layer(cin, cout, n, stride):
        return ([basic_block(cin, cout, stride)]
                + [basic_block(cout, cout, 1) for _ in range(n - 1)])

    p["layer1"] = make_layer(64, 64, 3, 1)
    p["layer2"] = make_layer(64, 128, 4, 2)
    p["layer3"] = make_layer(128, 256, 6, 2)
    p["layer4"] = make_layer(256, 512, 3, 2)

    def decoder(cin, cout):
        mid = cin // 4
        return {"conv1": conv_bn(1, 1, cin, mid),
                "deconv2": deconv_bn(3, mid, mid, pad=1, out_pad=1),
                "conv3": conv_bn(1, 1, mid, cout)}

    p["decoder4"] = decoder(512, 256)
    p["decoder3"] = decoder(256, 128)
    p["decoder2"] = decoder(128, 64)
    p["decoder1"] = decoder(64, 64)

    def ffm(c):
        # TODO(synk): mmseg FeatureFusionModule definition is external; BiSeNet-style FFM used here.
        return {"conv1": conv_bn(1, 1, 2 * c, c),
                "att1": conv_bias(1, 1, c, c),
                "att2": conv_bias(1, 1, c, c)}

    p["ffm1"] = ffm(filters[0])
    p["ffm2"] = ffm(filters[1])
    p["ffm3"] = ffm(filters[2])

    # TODO(synk): PiDiNet EDM ('carv4') is an external module; approximated by a 2-conv
    # stride-2 edge stem producing a [N, 64, H/2, W/2] feature with matching fusion shapes.
    p["edm"] = {"conv1": conv_bn(3, 3, 3, 64),
                "conv2": conv_bn(3, 3, 64, 64)}

    p["final"] = {"deconv1": deconv_bias(4, 64, 32, pad=1, out_pad=0),
                  "conv2": conv_bias(3, 3, 32, 32),
                  "conv3": conv_bias(3, 3, 32, out_channels)}
    return p


# ----------------------------------------------------------------------------
# Model forward
# ----------------------------------------------------------------------------
def basic_block_fwd(p, x):
    identity = x
    out = conv2d(x, p["conv1"], stride=p["stride"], pad=1, act="relu")
    if "down" in p:
        identity = conv2d(x, p["down"], stride=p["stride"], pad=0, act="none")
    # residual add + relu fused into the second conv's f32 epilogue
    out = conv2d(out, p["conv2"], stride=1, pad=1, residual=identity, act="relu")
    return out


def run_layer(blocks, x):
    for blk in blocks:
        x = basic_block_fwd(blk, x)
    return x


def decoder_fwd(p, x):
    x = conv2d(x, p["conv1"], act="relu")
    x = conv_transpose2d_s2(x, p["deconv2"], act="relu")
    x = conv2d(x, p["conv3"], act="relu")
    return x


def ffm_fwd(p, x_d, x_e):
    x = jnp.concatenate([x_d, x_e], axis=-1)
    feat = conv2d(x, p["conv1"], act="relu")
    c = feat.shape[-1]
    g = global_avg_pool(feat)                                       # [N, C]
    a = fused_matmul(g, p["att1"]["w"], p["att1"]["b"], c, act="relu")
    a = fused_matmul(a, p["att2"]["w"], p["att2"]["b"], c, act="sigmoid")
    return ffm_scale_fma(feat, a)                                   # feat * atten + feat


def final_head(p, x):
    x = conv_transpose2d_s2(x, p["deconv1"], act="relu")
    x = conv2d(x, p["conv2"], pad=1, act="relu")
    x = conv2d(x, p["conv3"], pad=1, act="none")
    return x


def birenet34_forward(p, x_nchw):
    # TODO(synk): BatchNorm layers are applied in folded (running-stats) form even though
    # is_Train=True in the reference; batch statistics are not recomputed.
    x = jnp.transpose(x_nchw, (0, 2, 3, 1)).astype(jnp.float32)     # NCHW -> NHWC

    # EDM edge branch
    e = conv2d(x, p["edm"]["conv1"], stride=2, pad=1, act="relu")
    edge = conv2d(e, p["edm"]["conv2"], stride=1, pad=1, act="relu")

    # Encoder (ResNet-34)
    h = conv2d(x, p["firstconv"], stride=2, pad=3, act="relu")
    e1 = maxpool_3x3_s2_p1(h)
    e1 = run_layer(p["layer1"], e1)
    e2 = run_layer(p["layer2"], e1)
    e3 = run_layer(p["layer3"], e2)
    e4 = run_layer(p["layer4"], e3)
    # has_DB = False -> Dblock skipped (matches reference config)

    # Decoders + feature fusion (has_FFM = True)
    d4 = ffm_fwd(p["ffm3"], decoder_fwd(p["decoder4"], e4), e3)
    d3 = ffm_fwd(p["ffm2"], decoder_fwd(p["decoder3"], d4), e2)
    d2 = ffm_fwd(p["ffm1"], decoder_fwd(p["decoder2"], d3), e1)
    d1 = elementwise_add(decoder_fwd(p["decoder1"], d2), edge)

    out = final_head(p["final"], d1)
    out_e = final_head(p["final"], edge)   # aux head on edge branch (is_Train, has_AuxHead)

    out = jnp.transpose(out, (0, 3, 1, 2))       # back to NCHW
    out_e = jnp.transpose(out_e, (0, 3, 1, 2))
    return (out, out_e)


if __name__ == "__main__":
    params = make_params(seed=0, out_channels=2)
    x = jax.random.normal(jax.random.PRNGKey(0), (2, 3, 64, 64), dtype=jnp.float32)
    out, out_e = birenet34_forward(params, x)
    out = jax.block_until_ready(out)
    out_e = jax.block_until_ready(out_e)
    assert out.shape == (2, 2, 64, 64), out.shape
    assert out_e.shape == (2, 2, 64, 64), out_e.shape
    assert bool(jnp.all(jnp.isfinite(out))) and bool(jnp.all(jnp.isfinite(out_e)))
    print("KERNEL_OK")
</pallas_src>

<mosaic_0001>
module attributes {stable_mosaic.version = 11 : i64} {
  func.func @_fused_mm_kernel(%arg0: i32, %arg1: i32, %arg2: i32, %arg3: memref<512x128xbf16, #tpu.memory_space<vmem>>, %arg4: memref<128x128xbf16, #tpu.memory_space<vmem>>, %arg5: memref<1x128xf32, #tpu.memory_space<vmem>>, %arg6: memref<512x128xf32, #tpu.memory_space<vmem>>, %arg7: memref<512x128xf32, #tpu.memory_space<vmem>>) attributes {dimension_semantics = [#tpu.dimension_semantics<parallel>, #tpu.dimension_semantics<parallel>, #tpu.dimension_semantics<arbitrary>], iteration_bounds = array<i64: 4, 1, 1>, scalar_prefetch = 0 : i64, scratch_operands = 1 : i64, tpu.core_type = #tpu.core_type<tc>, window_params = [{transform_indices = @transform_0, window_bounds = array<i64: 512, 128>}, {transform_indices = @transform_1, window_bounds = array<i64: 128, 128>}, {transform_indices = @transform_2, window_bounds = array<i64: 1, 128>}, {transform_indices = @transform_3, window_bounds = array<i64: 512, 128>}]} {
    %c0_i32 = arith.constant 0 : i32
    %0 = arith.cmpi eq, %arg2, %c0_i32 : i32
    %1 = arith.extui %0 : i1 to i32
    %c0_i32_0 = arith.constant 0 : i32
    %2 = arith.cmpi ne, %1, %c0_i32_0 : i32
    scf.if %2 {
      %cst_10 = arith.constant 0.000000e+00 : f32
      %12 = vector.broadcast %cst_10 : f32 to vector<512x128xf32>
      %c0_11 = arith.constant 0 : index
      %c0_12 = arith.constant 0 : index
      %13 = vector.load %arg7[%c0_11, %c0_12] : memref<512x128xf32, #tpu.memory_space<vmem>>, vector<512x128xf32>
      tpu.vector_store %arg7[%c0_11, %c0_12], %12 {strides = array<i32>} : memref<512x128xf32, #tpu.memory_space<vmem>>, vector<512x128xf32>,
    } else {
    }
    %c0 = arith.constant 0 : index
    %c0_1 = arith.constant 0 : index
    %3 = vector.load %arg7[%c0, %c0_1] : memref<512x128xf32, #tpu.memory_space<vmem>>, vector<512x128xf32>
    %c0_2 = arith.constant 0 : index
    %c0_3 = arith.constant 0 : index
    %4 = vector.load %arg3[%c0_2, %c0_3] : memref<512x128xbf16, #tpu.memory_space<vmem>>, vector<512x128xbf16>
    %c0_4 = arith.constant 0 : index
    %c0_5 = arith.constant 0 : index
    %5 = vector.load %arg4[%c0_4, %c0_5] : memref<128x128xbf16, #tpu.memory_space<vmem>>, vector<128x128xbf16>
    %cst = arith.constant dense<0.000000e+00> : vector<512x128xf32>
    %6 = tpu.matmul %4, %5, %cst {dimension_numbers = #tpu.dot_dimension_numbers<[1], [0], [0], [1], [0, 0, 1, 1], [], []>} : vector<512x128xbf16>, vector<128x128xbf16>, vector<512x128xf32> -> vector<512x128xf32>
    %7 = arith.addf %3, %6 : vector<512x128xf32>
    %c0_6 = arith.constant 0 : index
    %c0_7 = arith.constant 0 : index
    %8 = vector.load %arg7[%c0_6, %c0_7] : memref<512x128xf32, #tpu.memory_space<vmem>>, vector<512x128xf32>
    tpu.vector_store %arg7[%c0_6, %c0_7], %7 {strides = array<i32>} : memref<512x128xf32, #tpu.memory_space<vmem>>, vector<512x128xf32>,
    %c0_i32_8 = arith.constant 0 : i32
    %9 = arith.cmpi eq, %arg2, %c0_i32_8 : i32
    %10 = arith.extui %9 : i1 to i32
    %c0_i32_9 = arith.constant 0 : i32
    %11 = arith.cmpi ne, %10, %c0_i32_9 : i32
    scf.if %11 {
      %c0_10 = arith.constant 0 : index
      %c0_11 = arith.constant 0 : index
      %12 = vector.load %arg7[%c0_10, %c0_11] : memref<512x128xf32, #tpu.memory_space<vmem>>, vector<512x128xf32>
      %c0_12 = arith.constant 0 : index
      %c0_13 = arith.constant 0 : index
      %13 = vector.load %arg5[%c0_12, %c0_13] : memref<1x128xf32, #tpu.memory_space<vmem>>, vector<1x128xf32>
      %14 = vector.broadcast %13 : vector<1x128xf32> to vector<512x128xf32>
      %15 = arith.addf %12, %14 : vector<512x128xf32>
      %cst_14 = arith.constant 0.000000e+00 : f32
      %16 = vector.broadcast %cst_14 : f32 to vector<512x128xf32>
      %17 = arith.maximumf %15, %16 : vector<512x128xf32>
      %c0_15 = arith.constant 0 : index
      %c0_16 = arith.constant 0 : index
      %18 = vector.load %arg6[%c0_15, %c0_16] : memref<512x128xf32, #tpu.memory_space<vmem>>, vector<512x128xf32>
      tpu.vector_store %arg6[%c0_15, %c0_16], %17 {strides = array<i32>} : memref<512x128xf32, #tpu.memory_space<vmem>>, vector<512x128xf32>,
    } else {
    }
    return
  }
  func.func @transform_0(%arg0: i32, %arg1: i32, %arg2: i32) -> (i32, i32) {
    %c0_i32 = arith.constant 0 : i32
    return %arg0, %arg2 : i32, i32
  }
  func.func @transform_1(%arg0: i32, %arg1: i32, %arg2: i32) -> (i32, i32) {
    %c0_i32 = arith.constant 0 : i32
    return %arg2, %arg1 : i32, i32
  }
  func.func @transform_2(%arg0: i32, %arg1: i32, %arg2: i32) -> (i32, i32) {
    %c0_i32 = arith.constant 0 : i32
    %c0_i32_0 = arith.constant 0 : i32
    return %c0_i32, %arg1 : i32, i32
  }
  func.func @transform_3(%arg0: i32, %arg1: i32, %arg2: i32) -> (i32, i32) {
    %c0_i32 = arith.constant 0 : i32
    return %arg0, %arg1 : i32, i32
  }
}

</mosaic_0001>

<bundles_post_ra>
// kernel: tpu_custom_call.1
= control target key start
LH: loop header
LB: loop body
LE: loop exit
PB: predicated region body
PF: predicated region fallthrough
CT: control target
= control target key end

     0   :  { %s2222_s0 = inlined_call_operand.hbm [shape: bf16[2048,128], index: 0, kind: input, shape index: {}]   ;;  %s2223_s1 = inlined_call_operand.hbm [shape: bf16[128,128], index: 1, kind: input, shape index: {}]   ;;  %s2224_s2 = inlined_call_operand.vmem [shape: f32[1,128], index: 2, kind: input, shape index: {}]   ;;  %s2225_s3 = inlined_call_operand.hbm [shape: f32[2048,128], index: 3, kind: output, shape index: {}]  }
   0x1   :  { %2227 = sst [smem:[#allocation12_spill]] %s2223_s1 }
   0x2   :  { %8 = vsyncpa [#allocation4], 0 }
   0x3   :  { %10 = vsyncpa [#allocation4 + $0x1], 0 }
   0x4   :  { %11 = vsyncpa [#allocation7], 0 }
   0x5   :  { %12 = vsyncpa [#allocation5], 0 }
   0x6   :  { %14 = vsyncpa [#allocation5 + $0x1], 0  ;;  %s1898_s12 = smov 0   ;;  %s1900_s13 = smov 0  }
   0x7   :  { %s1902_s14 = smov 0   ;;  %s1904_s15 = smov 0  }
   0x8   :  { %s1906_s16 = smov 0   ;;  %s1908_s17 = smov 0  }
   0x9 LB: > { %s1403_s18 = sadd.s32 4294967295, %s1871_s17   ;;  %s1404_s19 = sadd.s32 4294967294, %s1871_s17   ;;  %s1871_s17 = sphi %s1908_s17, %s20_s17   ;;  %s1867_s16 = sphi %s1906_s16, %s2241_s16   ;;  %s1863_s15 = sphi %s1904_s15, %s2240_s15   ;;  %s1859_s14 = sphi %s1902_s14, %s2239_s14   ;;  %s1855_s13 = sphi %s1900_s13, %s2238_s13   ;;  %s1851_s12 = sphi %s1898_s12, %s2237_s12  }
   0xa   : > { %p61_p0 = scmp.ne.s32.totalorder %s1855_s13, %s1851_s12  ;;  %p1932_p1 = scmp.eq.s32.totalorder %s1403_s18, 0 }
   0xb   : > { %p1936_p2 = scmp.eq.s32.totalorder %s1403_s18, 3  ;;  %p147_p3 = scmp.eq.s32.totalorder %s1404_s19, 3 }
   0xc   : > { %p1942_p4 = por %p1932_p1, %p61_p0  ;;  %p1405_p5 = scmp.ge.s32.totalorder %s1871_s17, 1 }
   0xd   : > { %p1947_p6 = por %p147_p3, %p61_p0  ;;  %p154_p7 = scmp.lt.s32.totalorder %s1871_s17, 5 }
   0xe   : > { %s2232_s1 = sld [smem:[#allocation12_spill]]  ;;  %s1873_s28 = smov [#allocation6]  }
   0xf   : > { %p1955_p8 = pnand %p1405_p5, %p154_p7  ;;  %s171_s29 = sshll.u32 %s1873_s28, 4  ;;  %s172_s29 = int_to_ptr.vmem [resolvable:$true] %s171_s29 }
  0x10   : > { %s2226_s30 = smov 64   ;;  %s1875_s4 = smov 4  }
  0x11   : > { %p1655_p9 = pneg %p1955_p8  ;;  %s39_s5 = sadd.s32 1, %s1867_s16 }
  0x12   : > { %p41_p11 = scmp.ge.s32.totalorder %s39_s5, 4  ;;  %s48_s6 = sadd.s32 1, %s1859_s14 }
  0x13   : > { %p1656_p10 = pnand %p1655_p9, %p1932_p1  ;;  %p55_p12 = scmp.ne.s32.totalorder %s1859_s14, %s1855_s13 }
  0x14   : > { %s169_s26 = sshll.u32 %s2232_s1, 4  ;;  %p56_p13 = scmp.eq.s32.totalorder %s1871_s17, 0  ;;  %s170_s26 = int_to_ptr.hbm [resolvable:$true] %s169_s26 }
  0x15   : > { %1658 = dma.hbm_to_vmem [thread:$0]  (!%p1656_p10), %s170_s26, 1024, %s172_s29, [#allocation7], %s2226_s30, %s2226_s30, %s1875_s4  }
  0x16   : > { %s2243_s5 = smov (%p41_p11, %s39_s5), 0  ;;  %p1973_p0 = por %p56_p13, %p55_p12 }
  0x17   : > { %p1979_p3 = por %p1936_p2, %p55_p12  ;;  %s43_s9 = ssub.s32 %s1867_s16, %s2243_s5 }
  0x18   : > { %p1668_p5 = scmp.lt.s32.totalorder %s1871_s17, 4  ;;  %p46_p7 = scmp.eq.s32.totalorder %s43_s9, 0 }
  0x19   : > { %s191_s10 = sand.u32 1, %s1859_s14   ;;  %s1581_s19 = sshll.u32 %s1867_s16, 8 }
  0x1a   : > { %s1409_s11 = sshll.u32 %s191_s10, 8  ;;  %s201_s26 = scalar_lea.hbm %s2222_s0, %s1581_s19 }
  0x1b   : > { %s1988_s18 = scalar_select %p46_p7, %s1859_s14, %s48_s6  }
  0x1c   : > { %s195_s28 = scalar_lea.vmem [#allocation3], %s1409_s11  ;;  %s202_s21 = sshll.u32 %s201_s26, 4  ;;  %s203_s21 = int_to_ptr.hbm [resolvable:$true] %s202_s21 }
  0x1d   : > { %s204_s29 = sshll.u32 %s195_s28, 4  ;;  %p1660_p2 = pnand %p1668_p5, %p1973_p0  ;;  %s205_s29 = int_to_ptr.vmem [resolvable:$true] %s204_s29 }
  0x1e   : > { %s192_s30 = scalar_lea.sflag [#allocation4], %s191_s10  ;;  %s2236_s1 = smov 64  }
  0x1f   : > { %1662 = dma.hbm_to_vmem [thread:$0]  (!%p1660_p2), %s203_s21, 4096, %s205_s29, %s192_s30, %s2236_s1, %s2236_s1, %s1875_s4  }
  0x20   : > { %216 = sbr.rel (%p1955_p8) target bundleno = 334 (0x14e), region = 32  ;;  %s2002_s6 = sand.u32 (!%p1955_p8), 1, %s1855_s13  }
  0x21   : > { %s1413_s9 = sshll.u32 (!%p1955_p8), %s2002_s6, 8  ;;  %s219_s11 = scalar_lea.sflag (!%p1955_p8), [#allocation4], %s2002_s6 }
  0x22   : > { %s2006_s19 = scalar_lea.vmem (!%p1955_p8), [#allocation3], %s1413_s9 }
  0x25   : > { %1838 = dma.done.wait (%p1942_p4), %s219_s11, 4096  }
  0x26   : > { %1840 = vsyncadd (%p1942_p4), %s219_s11, 4294963200 }
  0x27   : > { %1842 = dma.done.wait (%p1932_p1), [#allocation7], 1024  }
  0x28   : > { %1844 = vsyncadd (%p1932_p1), [#allocation7], 4294966272  ;;  %v1621_v0 = vld [vmem:[#allocation6 + $0x38] sm:$0xff]  ;;  %v1620_v1 = vld [vmem:[#allocation6 + $0x30] sm:$0xff]  ;;  %s1415_s22 = sshll.u32 %s2002_s6, 9  ;;  %s1622_s30 = sshll.u32 %s1863_s15, 9 }
  0x29   : > { %712 = vmatpush.bf16.msra.mxu0 %v1621_v0  ;;  %1623 = vmatpush.bf16.msra.mxu1 %v1621_v0  ;;  %v1619_v2 = vld [vmem:[#allocation6 + $0x28] sm:$0xff]  ;;  %v1618_v3 = vld [vmem:[#allocation6 + $0x20] sm:$0xff]  ;;  %v1617_v4 = vld [vmem:[#allocation6 + $0x18] sm:$0xff]  ;;  %s2056_s27 = scalar_lea.vmem [#allocation8], %s1415_s22  ;;  %s1285_s10 = scalar_lea.hbm %s2225_s3, %s1622_s30 }
  0x2a   : > { %1624 = vmatpush.bf16.msra.mxu2 %v1621_v0  ;;  %1625 = vmatpush.bf16.msra.mxu3 %v1621_v0  ;;  %v1616_v5 = vld [vmem:[#allocation6 + $0x10] sm:$0xff]  ;;  %v1615_v6 = vld [vmem:[#allocation6 + $0x8] sm:$0xff]  ;;  %v1614_v7 = vld [vmem:[#allocation6] sm:$0xff]  ;;  %s1286_s24 = sshll.u32 %s2056_s27, 4  ;;  %s1288_s15 = sshll.u32 %s1285_s10, 4  ;;  %s1287_s24 = int_to_ptr.vmem [resolvable:$true] %s1286_s24  ;;  %s1289_s15 = int_to_ptr.hbm [resolvable:$true] %s1288_s15 }
  0x2b   : > { %v1582_v8 = vld [vmem:[%s2006_s19] sm:$0xff]  ;;  %v1583_v12 = vld [vmem:[%s2006_s19 + $0x8] sm:$0xff]  ;;  %v1584_v16 = vld [vmem:[%s2006_s19 + $0x10] sm:$0xff]  ;;  %s1273_s25 = scalar_lea.sflag [#allocation5], %s2002_s6  ;;  %s1799_s26 = sshra.s32 %s1289_s15, 4  ;;  %s1800_s26 = int_to_ptr.hbm [resolvable:$true] %s1799_s26 }
  0x2c   : > { %v1590_v9 = vld [vmem:[%s2006_s19 + $0x40] sm:$0xff]  ;;  %v1591_v13 = vld [vmem:[%s2006_s19 + $0x48] sm:$0xff]  ;;  %v1592_v17 = vld [vmem:[%s2006_s19 + $0x50] sm:$0xff]  ;;  %s1801_s28 = scalar_lea.hbm %s1800_s26, 512  ;;  %s1805_s9 = scalar_lea.hbm %s2225_s3, 2048 }
  0x2d   : > { %713 = vmatpush.bf16.msra.mxu0 %v1620_v1  ;;  %1626 = vmatpush.bf16.msra.mxu1 %v1620_v1  ;;  %v1598_v10 = vld [vmem:[%s2006_s19 + $0x80] sm:$0xff]  ;;  %v1599_v14 = vld [vmem:[%s2006_s19 + $0x88] sm:$0xff]  ;;  %v1600_v18 = vld [vmem:[%s2006_s19 + $0x90] sm:$0xff]  ;;  %p1802_p1 = scmp.ne.s32.totalorder %s1800_s26, %s1801_s28  ;;  %p1806_p9 = scmp.lt.s32.totalorder %s1800_s26, %s2225_s3 }
  0x2e   : > { %1627 = vmatpush.bf16.msra.mxu2 %v1620_v1  ;;  %1628 = vmatpush.bf16.msra.mxu3 %v1620_v1  ;;  %v1606_v11 = vld [vmem:[%s2006_s19 + $0xc0] sm:$0xff]  ;;  %v1607_v15 = vld [vmem:[%s2006_s19 + $0xc8] sm:$0xff]  ;;  %v1608_v19 = vld [vmem:[%s2006_s19 + $0xd0] sm:$0xff]  ;;  %p1807_p10 = scmp.lt.s32.totalorder %s1805_s9, %s1801_s28 }
  0x2f   : > { %v1585_v20 = vld [vmem:[%s2006_s19 + $0x18] sm:$0xff]  ;;  %v1586_v24 = vld [vmem:[%s2006_s19 + $0x20] sm:$0xff]  ;;  %v1587_v28 = vld [vmem:[%s2006_s19 + $0x28] sm:$0xff]  ;;  %p1803_p4 = pnand %p1802_p1, %p1979_p3 }
  0x30   : > { %v1593_v21 = vld [vmem:[%s2006_s19 + $0x58] sm:$0xff]  ;;  %v1594_v25 = vld [vmem:[%s2006_s19 + $0x60] sm:$0xff]  ;;  %v1595_v29 = vld [vmem:[%s2006_s19 + $0x68] sm:$0xff]  ;;  %p1808_p11 = por %p1807_p10, %p1806_p9 }
  0x31   : > { %714 = vmatpush.bf16.msra.mxu0 %v1619_v2  ;;  %1629 = vmatpush.bf16.msra.mxu1 %v1619_v2  ;;  %v1601_v22 = vld [vmem:[%s2006_s19 + $0x98] sm:$0xff]  ;;  %v1602_v26 = vld [vmem:[%s2006_s19 + $0xa0] sm:$0xff]  ;;  %v1603_v30 = vld [vmem:[%s2006_s19 + $0xa8] sm:$0xff]  ;;  %p1804_p8 = pneg %p1803_p4 }
  0x32   : > { %1630 = vmatpush.bf16.msra.mxu2 %v1619_v2  ;;  %1631 = vmatpush.bf16.msra.mxu3 %v1619_v2  ;;  %v1609_v23 = vld [vmem:[%s2006_s19 + $0xd8] sm:$0xff]  ;;  %v1610_v27 = vld [vmem:[%s2006_s19 + $0xe0] sm:$0xff]  ;;  %v1611_v31 = vld [vmem:[%s2006_s19 + $0xe8] sm:$0xff] }
  0x33   : > { %v1588_v32 = vld [vmem:[%s2006_s19 + $0x30] sm:$0xff]  ;;  %v1589_v36 = vld [vmem:[%s2006_s19 + $0x38] sm:$0xff]  ;;  %v2051_v40 = vld [vmem:[%s2224_s2] ss:$0 sm:$0xff]  ;;  %p1809_p12 = pnand %p1808_p11, %p1804_p8 }
  0x34   : > { %v1596_v33 = vld [vmem:[%s2006_s19 + $0x70] sm:$0xff]  ;;  %v1597_v37 = vld [vmem:[%s2006_s19 + $0x78] sm:$0xff] }
  0x35   : > { %715 = vmatpush.bf16.msra.mxu0 %v1618_v3  ;;  %1632 = vmatpush.bf16.msra.mxu1 %v1618_v3  ;;  %v1604_v34 = vld [vmem:[%s2006_s19 + $0xb0] sm:$0xff]  ;;  %v1605_v38 = vld [vmem:[%s2006_s19 + $0xb8] sm:$0xff] }
  0x36   : > { %1633 = vmatpush.bf16.msra.mxu2 %v1618_v3  ;;  %1634 = vmatpush.bf16.msra.mxu3 %v1618_v3  ;;  %v1612_v35 = vld [vmem:[%s2006_s19 + $0xf0] sm:$0xff]  ;;  %v1613_v39 = vld [vmem:[%s2006_s19 + $0xf8] sm:$0xff] }
  0x39   : > { %716 = vmatpush.bf16.msra.mxu0 %v1617_v4  ;;  %1635 = vmatpush.bf16.msra.mxu1 %v1617_v4 }
  0x3a   : > { %1636 = vmatpush.bf16.msra.mxu2 %v1617_v4  ;;  %1637 = vmatpush.bf16.msra.mxu3 %v1617_v4 }
  0x3d   : > { %717 = vmatpush.bf16.msra.mxu0 %v1616_v5  ;;  %1638 = vmatpush.bf16.msra.mxu1 %v1616_v5 }
  0x3e   : > { %1639 = vmatpush.bf16.msra.mxu2 %v1616_v5  ;;  %1640 = vmatpush.bf16.msra.mxu3 %v1616_v5 }
  0x41   : > { %718 = vmatpush.bf16.msra.mxu0 %v1615_v6  ;;  %1641 = vmatpush.bf16.msra.mxu1 %v1615_v6 }
  0x42   : > { %1642 = vmatpush.bf16.msra.mxu2 %v1615_v6  ;;  %1643 = vmatpush.bf16.msra.mxu3 %v1615_v6 }
  0x45   : > { %719 = vmatpush.bf16.msra.mxu0 %v1614_v7  ;;  %1644 = vmatpush.bf16.msra.mxu1 %v1614_v7 }
  0x46   : > { %1645 = vmatpush.bf16.msra.mxu2 %v1614_v7  ;;  %1646 = vmatpush.bf16.msra.mxu3 %v1614_v7 }
  0x48   : > { %720 = vmatmul.bf16.vlgmr.msra.gmra.mxu0 %v1582_v8  ;;  %760 = vmatmul.bf16.vlgmr.msra.gmra.mxu1 %v1590_v9 }
  0x49   : > { %800 = vmatmul.bf16.vlgmr.msra.gmra.mxu2 %v1598_v10  ;;  %840 = vmatmul.bf16.vlgmr.msra.gmra.mxu3 %v1606_v11 }
  0x58   : > { %725 = vmatmul.bf16.gmra.mxu0 %v1583_v12  ;;  %765 = vmatmul.bf16.gmra.mxu1 %v1591_v13 }
  0x59   : > { %805 = vmatmul.bf16.gmra.mxu2 %v1599_v14  ;;  %845 = vmatmul.bf16.gmra.mxu3 %v1607_v15 }
  0x68   : > { %730 = vmatmul.bf16.gmra.mxu0 %v1584_v16  ;;  %770 = vmatmul.bf16.gmra.mxu1 %v1592_v17 }
  0x69   : > { %810 = vmatmul.bf16.gmra.mxu2 %v1600_v18  ;;  %850 = vmatmul.bf16.gmra.mxu3 %v1608_v19 }
  0x78   : > { %735 = vmatmul.bf16.gmra.mxu0 %v1585_v20  ;;  %775 = vmatmul.bf16.gmra.mxu1 %v1593_v21 }
  0x79   : > { %815 = vmatmul.bf16.gmra.mxu2 %v1601_v22  ;;  %855 = vmatmul.bf16.gmra.mxu3 %v1609_v23 }
  0x88   : > { %740 = vmatmul.bf16.gmra.mxu0 %v1586_v24  ;;  %780 = vmatmul.bf16.gmra.mxu1 %v1594_v25 }
  0x89   : > { %820 = vmatmul.bf16.gmra.mxu2 %v1602_v26  ;;  %860 = vmatmul.bf16.gmra.mxu3 %v1610_v27 }
  0x98   : > { %745 = vmatmul.bf16.gmra.mxu0 %v1587_v28  ;;  %785 = vmatmul.bf16.gmra.mxu1 %v1595_v29 }
  0x99   : > { %825 = vmatmul.bf16.gmra.mxu2 %v1603_v30  ;;  %865 = vmatmul.bf16.gmra.mxu3 %v1611_v31 }
  0xa8   : > { %750 = vmatmul.bf16.gmra.mxu0 %v1588_v32  ;;  %790 = vmatmul.bf16.gmra.mxu1 %v1596_v33 }
  0xa9   : > { %830 = vmatmul.bf16.gmra.mxu2 %v1604_v34  ;;  %870 = vmatmul.bf16.gmra.mxu3 %v1612_v35 }
  0xb8   : > { %755 = vmatmul.bf16.gmra.mxu0 %v1589_v36  ;;  %795 = vmatmul.bf16.gmra.mxu1 %v1597_v37 }
  0xb9   : > { %835 = vmatmul.bf16.gmra.mxu2 %v1605_v38  ;;  %875 = vmatmul.bf16.gmra.mxu3 %v1613_v39 }
  0xc5   : > { %v721_v41 = vpop.f32.mrf.mxu0  ;;  %v761_v42 = vpop.f32.mrf.mxu1 }
  0xc6   : > { %v1080_v43 = vadd.f32 %v2051_v40, %v721_v41  ;;  %v1096_v44 = vadd.f32 %v2051_v40, %v761_v42 }
  0xc8   : > { %v1144_v45 = vmax.f32 %v1080_v43, 0.0  ;;  %v1160_v46 = vmax.f32 %v1096_v44, 0.0 }
  0xca   : > { %1208 = vst [vmem:[%s2056_s27] sm:$0xff] %v1144_v45 }
  0xcb   : > { %1224 = vst [vmem:[%s2056_s27 + $0x80] sm:$0xff] %v1160_v46 }
  0xcc   : > { %v801_v47 = vpop.f32.mrf.mxu2  ;;  %v841_v48 = vpop.f32.mrf.mxu3 }
  0xcd   : > { %v1112_v49 = vadd.f32 %v2051_v40, %v801_v47  ;;  %v1128_v50 = vadd.f32 %v2051_v40, %v841_v48  ;;  %v723_v51 = vpop.f32.mrf.mxu0  ;;  %v763_v52 = vpop.f32.mrf.mxu1 }
  0xce   : > { %v1081_v53 = vadd.f32 %v2051_v40, %v723_v51  ;;  %v1097_v54 = vadd.f32 %v2051_v40, %v763_v52 }
  0xcf   : > { %v1176_v55 = vmax.f32 %v1112_v49, 0.0  ;;  %v1192_v56 = vmax.f32 %v1128_v50, 0.0 }
  0xd0   : > { %v1145_v57 = vmax.f32 %v1081_v53, 0.0  ;;  %v1161_v58 = vmax.f32 %v1097_v54, 0.0 }
  0xd1   : > { %1240 = vst [vmem:[%s2056_s27 + $0x100] sm:$0xff] %v1176_v55 }
  0xd2   : > { %1256 = vst [vmem:[%s2056_s27 + $0x180] sm:$0xff] %v1192_v56 }
  0xd3   : > { %1209 = vst [vmem:[%s2056_s27 + $0x8] sm:$0xff] %v1145_v57 }
  0xd4   : > { %1225 = vst [vmem:[%s2056_s27 + $0x88] sm:$0xff] %v1161_v58  ;;  %v803_v59 = vpop.f32.mrf.mxu2  ;;  %v843_v60 = vpop.f32.mrf.mxu3 }
  0xd5   : > { %v1113_v61 = vadd.f32 %v2051_v40, %v803_v59  ;;  %v1129_v62 = vadd.f32 %v2051_v40, %v843_v60  ;;  %v726_v63 = vpop.f32.mrf.mxu0  ;;  %v766_v0 = vpop.f32.mrf.mxu1 }
  0xd6   : > { %v1082_v1 = vadd.f32 %v2051_v40, %v726_v63  ;;  %v1098_v2 = vadd.f32 %v2051_v40, %v766_v0 }
  0xd7   : > { %v1177_v3 = vmax.f32 %v1113_v61, 0.0  ;;  %v1193_v4 = vmax.f32 %v1129_v62, 0.0 }
  0xd8   : > { %v1146_v5 = vmax.f32 %v1082_v1, 0.0  ;;  %v1162_v6 = vmax.f32 %v1098_v2, 0.0 }
  0xd9   : > { %1241 = vst [vmem:[%s2056_s27 + $0x108] sm:$0xff] %v1177_v3 }
  0xda   : > { %1257 = vst [vmem:[%s2056_s27 + $0x188] sm:$0xff] %v1193_v4 }
  0xdb   : > { %1210 = vst [vmem:[%s2056_s27 + $0x10] sm:$0xff] %v1146_v5 }
  0xdc   : > { %1226 = vst [vmem:[%s2056_s27 + $0x90] sm:$0xff] %v1162_v6  ;;  %v806_v7 = vpop.f32.mrf.mxu2  ;;  %v846_v8 = vpop.f32.mrf.mxu3 }
  0xdd   : > { %v1114_v9 = vadd.f32 %v2051_v40, %v806_v7  ;;  %v1130_v10 = vadd.f32 %v2051_v40, %v846_v8  ;;  %v728_v11 = vpop.f32.mrf.mxu0  ;;  %v768_v12 = vpop.f32.mrf.mxu1 }
  0xde   : > { %v1083_v13 = vadd.f32 %v2051_v40, %v728_v11  ;;  %v1099_v14 = vadd.f32 %v2051_v40, %v768_v12 }
  0xdf   : > { %v1178_v15 = vmax.f32 %v1114_v9, 0.0  ;;  %v1194_v16 = vmax.f32 %v1130_v10, 0.0 }
  0xe0   : > { %v1147_v17 = vmax.f32 %v1083_v13, 0.0  ;;  %v1163_v18 = vmax.f32 %v1099_v14, 0.0 }
  0xe1   : > { %1242 = vst [vmem:[%s2056_s27 + $0x110] sm:$0xff] %v1178_v15 }
  0xe2   : > { %1258 = vst [vmem:[%s2056_s27 + $0x190] sm:$0xff] %v1194_v16 }
  0xe3   : > { %1211 = vst [vmem:[%s2056_s27 + $0x18] sm:$0xff] %v1147_v17 }
  0xe4   : > { %1227 = vst [vmem:[%s2056_s27 + $0x98] sm:$0xff] %v1163_v18  ;;  %v808_v19 = vpop.f32.mrf.mxu2  ;;  %v848_v20 = vpop.f32.mrf.mxu3 }
  0xe5   : > { %v1115_v21 = vadd.f32 %v2051_v40, %v808_v19  ;;  %v1131_v22 = vadd.f32 %v2051_v40, %v848_v20  ;;  %v731_v23 = vpop.f32.mrf.mxu0  ;;  %v771_v24 = vpop.f32.mrf.mxu1 }
  0xe6   : > { %v1084_v25 = vadd.f32 %v2051_v40, %v731_v23  ;;  %v1100_v26 = vadd.f32 %v2051_v40, %v771_v24 }
  0xe7   : > { %v1179_v27 = vmax.f32 %v1115_v21, 0.0  ;;  %v1195_v28 = vmax.f32 %v1131_v22, 0.0 }
  0xe8   : > { %v1148_v29 = vmax.f32 %v1084_v25, 0.0  ;;  %v1164_v30 = vmax.f32 %v1100_v26, 0.0 }
  0xe9   : > { %1243 = vst [vmem:[%s2056_s27 + $0x118] sm:$0xff] %v1179_v27 }
  0xea   : > { %1259 = vst [vmem:[%s2056_s27 + $0x198] sm:$0xff] %v1195_v28 }
  0xeb   : > { %1212 = vst [vmem:[%s2056_s27 + $0x20] sm:$0xff] %v1148_v29 }
  0xec   : > { %1228 = vst [vmem:[%s2056_s27 + $0xa0] sm:$0xff] %v1164_v30  ;;  %v811_v31 = vpop.f32.mrf.mxu2  ;;  %v851_v32 = vpop.f32.mrf.mxu3 }
  0xed   : > { %v1116_v33 = vadd.f32 %v2051_v40, %v811_v31  ;;  %v1132_v34 = vadd.f32 %v2051_v40, %v851_v32  ;;  %v733_v35 = vpop.f32.mrf.mxu0  ;;  %v773_v36 = vpop.f32.mrf.mxu1 }
  0xee   : > { %v1085_v37 = vadd.f32 %v2051_v40, %v733_v35  ;;  %v1101_v38 = vadd.f32 %v2051_v40, %v773_v36 }
  0xef   : > { %v1180_v39 = vmax.f32 %v1116_v33, 0.0  ;;  %v1196_v41 = vmax.f32 %v1132_v34, 0.0 }
  0xf0   : > { %v1149_v42 = vmax.f32 %v1085_v37, 0.0  ;;  %v1165_v43 = vmax.f32 %v1101_v38, 0.0 }
  0xf1   : > { %1244 = vst [vmem:[%s2056_s27 + $0x120] sm:$0xff] %v1180_v39 }
  0xf2   : > { %1260 = vst [vmem:[%s2056_s27 + $0x1a0] sm:$0xff] %v1196_v41 }
  0xf3   : > { %1213 = vst [vmem:[%s2056_s27 + $0x28] sm:$0xff] %v1149_v42 }
  0xf4   : > { %1229 = vst [vmem:[%s2056_s27 + $0xa8] sm:$0xff] %v1165_v43  ;;  %v813_v44 = vpop.f32.mrf.mxu2  ;;  %v853_v45 = vpop.f32.mrf.mxu3 }
  0xf5   : > { %v1117_v46 = vadd.f32 %v2051_v40, %v813_v44  ;;  %v1133_v47 = vadd.f32 %v2051_v40, %v853_v45  ;;  %v736_v48 = vpop.f32.mrf.mxu0  ;;  %v776_v49 = vpop.f32.mrf.mxu1 }
  0xf6   : > { %v1086_v50 = vadd.f32 %v2051_v40, %v736_v48  ;;  %v1102_v51 = vadd.f32 %v2051_v40, %v776_v49 }
  0xf7   : > { %v1181_v52 = vmax.f32 %v1117_v46, 0.0  ;;  %v1197_v53 = vmax.f32 %v1133_v47, 0.0 }
  0xf8   : > { %v1150_v54 = vmax.f32 %v1086_v50, 0.0  ;;  %v1166_v55 = vmax.f32 %v1102_v51, 0.0 }
  0xf9   : > { %1245 = vst [vmem:[%s2056_s27 + $0x128] sm:$0xff] %v1181_v52 }
  0xfa   : > { %1261 = vst [vmem:[%s2056_s27 + $0x1a8] sm:$0xff] %v1197_v53 }
  0xfb   : > { %1214 = vst [vmem:[%s2056_s27 + $0x30] sm:$0xff] %v1150_v54 }
  0xfc   : > { %1230 = vst [vmem:[%s2056_s27 + $0xb0] sm:$0xff] %v1166_v55  ;;  %v816_v56 = vpop.f32.mrf.mxu2  ;;  %v856_v57 = vpop.f32.mrf.mxu3 }
  0xfd   : > { %v1118_v58 = vadd.f32 %v2051_v40, %v816_v56  ;;  %v1134_v59 = vadd.f32 %v2051_v40, %v856_v57  ;;  %v738_v60 = vpop.f32.mrf.mxu0  ;;  %v778_v61 = vpop.f32.mrf.mxu1 }
  0xfe   : > { %v1087_v62 = vadd.f32 %v2051_v40, %v738_v60  ;;  %v1103_v63 = vadd.f32 %v2051_v40, %v778_v61 }
  0xff   : > { %v1182_v0 = vmax.f32 %v1118_v58, 0.0  ;;  %v1198_v1 = vmax.f32 %v1134_v59, 0.0 }
 0x100   : > { %v1151_v2 = vmax.f32 %v1087_v62, 0.0  ;;  %v1167_v3 = vmax.f32 %v1103_v63, 0.0 }
 0x101   : > { %1246 = vst [vmem:[%s2056_s27 + $0x130] sm:$0xff] %v1182_v0 }
 0x102   : > { %1262 = vst [vmem:[%s2056_s27 + $0x1b0] sm:$0xff] %v1198_v1 }
 0x103   : > { %1215 = vst [vmem:[%s2056_s27 + $0x38] sm:$0xff] %v1151_v2 }
 0x104   : > { %1231 = vst [vmem:[%s2056_s27 + $0xb8] sm:$0xff] %v1167_v3  ;;  %v818_v4 = vpop.f32.mrf.mxu2  ;;  %v858_v5 = vpop.f32.mrf.mxu3 }
 0x105   : > { %v1119_v6 = vadd.f32 %v2051_v40, %v818_v4  ;;  %v1135_v7 = vadd.f32 %v2051_v40, %v858_v5  ;;  %v741_v8 = vpop.f32.mrf.mxu0  ;;  %v781_v9 = vpop.f32.mrf.mxu1 }
 0x106   : > { %v1088_v10 = vadd.f32 %v2051_v40, %v741_v8  ;;  %v1104_v11 = vadd.f32 %v2051_v40, %v781_v9 }
 0x107   : > { %v1183_v12 = vmax.f32 %v1119_v6, 0.0  ;;  %v1199_v13 = vmax.f32 %v1135_v7, 0.0 }
 0x108   : > { %v1152_v14 = vmax.f32 %v1088_v10, 0.0  ;;  %v1168_v15 = vmax.f32 %v1104_v11, 0.0 }
 0x109   : > { %1247 = vst [vmem:[%s2056_s27 + $0x138] sm:$0xff] %v1183_v12 }
 0x10a   : > { %1263 = vst [vmem:[%s2056_s27 + $0x1b8] sm:$0xff] %v1199_v13 }
 0x10b   : > { %1216 = vst [vmem:[%s2056_s27 + $0x40] sm:$0xff] %v1152_v14 }
 0x10c   : > { %1232 = vst [vmem:[%s2056_s27 + $0xc0] sm:$0xff] %v1168_v15  ;;  %v821_v16 = vpop.f32.mrf.mxu2  ;;  %v861_v17 = vpop.f32.mrf.mxu3 }
 0x10d   : > { %v1120_v18 = vadd.f32 %v2051_v40, %v821_v16  ;;  %v1136_v19 = vadd.f32 %v2051_v40, %v861_v17  ;;  %v743_v20 = vpop.f32.mrf.mxu0  ;;  %v783_v21 = vpop.f32.mrf.mxu1 }
 0x10e   : > { %v1089_v22 = vadd.f32 %v2051_v40, %v743_v20  ;;  %v1105_v23 = vadd.f32 %v2051_v40, %v783_v21 }
 0x10f   : > { %v1184_v24 = vmax.f32 %v1120_v18, 0.0  ;;  %v1200_v25 = vmax.f32 %v1136_v19, 0.0 }
 0x110   : > { %v1153_v26 = vmax.f32 %v1089_v22, 0.0  ;;  %v1169_v27 = vmax.f32 %v1105_v23, 0.0 }
 0x111   : > { %1248 = vst [vmem:[%s2056_s27 + $0x140] sm:$0xff] %v1184_v24 }
 0x112   : > { %1264 = vst [vmem:[%s2056_s27 + $0x1c0] sm:$0xff] %v1200_v25 }
 0x113   : > { %1217 = vst [vmem:[%s2056_s27 + $0x48] sm:$0xff] %v1153_v26 }
 0x114   : > { %1233 = vst [vmem:[%s2056_s27 + $0xc8] sm:$0xff] %v1169_v27  ;;  %v823_v28 = vpop.f32.mrf.mxu2  ;;  %v863_v29 = vpop.f32.mrf.mxu3 }
 0x115   : > { %v1121_v30 = vadd.f32 %v2051_v40, %v823_v28  ;;  %v1137_v31 = vadd.f32 %v2051_v40, %v863_v29  ;;  %v746_v32 = vpop.f32.mrf.mxu0  ;;  %v786_v33 = vpop.f32.mrf.mxu1 }
 0x116   : > { %v1090_v34 = vadd.f32 %v2051_v40, %v746_v32  ;;  %v1106_v35 = vadd.f32 %v2051_v40, %v786_v33 }
 0x117   : > { %v1185_v36 = vmax.f32 %v1121_v30, 0.0  ;;  %v1201_v37 = vmax.f32 %v1137_v31, 0.0 }
 0x118   : > { %v1154_v38 = vmax.f32 %v1090_v34, 0.0  ;;  %v1170_v39 = vmax.f32 %v1106_v35, 0.0 }
 0x119   : > { %1249 = vst [vmem:[%s2056_s27 + $0x148] sm:$0xff] %v1185_v36 }
 0x11a   : > { %1265 = vst [vmem:[%s2056_s27 + $0x1c8] sm:$0xff] %v1201_v37 }
 0x11b   : > { %1218 = vst [vmem:[%s2056_s27 + $0x50] sm:$0xff] %v1154_v38 }
 0x11c   : > { %1234 = vst [vmem:[%s2056_s27 + $0xd0] sm:$0xff] %v1170_v39  ;;  %v826_v41 = vpop.f32.mrf.mxu2  ;;  %v866_v42 = vpop.f32.mrf.mxu3 }
 0x11d   : > { %v1122_v43 = vadd.f32 %v2051_v40, %v826_v41  ;;  %v1138_v44 = vadd.f32 %v2051_v40, %v866_v42  ;;  %v748_v45 = vpop.f32.mrf.mxu0  ;;  %v788_v46 = vpop.f32.mrf.mxu1 }
 0x11e   : > { %v1091_v47 = vadd.f32 %v2051_v40, %v748_v45  ;;  %v1107_v48 = vadd.f32 %v2051_v40, %v788_v46 }
 0x11f   : > { %v1186_v49 = vmax.f32 %v1122_v43, 0.0  ;;  %v1202_v50 = vmax.f32 %v1138_v44, 0.0 }
 0x120   : > { %v1155_v51 = vmax.f32 %v1091_v47, 0.0  ;;  %v1171_v52 = vmax.f32 %v1107_v48, 0.0 }
 0x121   : > { %1250 = vst [vmem:[%s2056_s27 + $0x150] sm:$0xff] %v1186_v49 }
 0x122   : > { %1266 = vst [vmem:[%s2056_s27 + $0x1d0] sm:$0xff] %v1202_v50 }
 0x123   : > { %1219 = vst [vmem:[%s2056_s27 + $0x58] sm:$0xff] %v1155_v51 }
 0x124   : > { %1235 = vst [vmem:[%s2056_s27 + $0xd8] sm:$0xff] %v1171_v52  ;;  %v828_v53 = vpop.f32.mrf.mxu2  ;;  %v868_v54 = vpop.f32.mrf.mxu3 }
 0x125   : > { %v1123_v55 = vadd.f32 %v2051_v40, %v828_v53  ;;  %v1139_v56 = vadd.f32 %v2051_v40, %v868_v54  ;;  %v751_v57 = vpop.f32.mrf.mxu0  ;;  %v791_v58 = vpop.f32.mrf.mxu1 }
 0x126   : > { %v1092_v59 = vadd.f32 %v2051_v40, %v751_v57  ;;  %v1108_v60 = vadd.f32 %v2051_v40, %v791_v58 }
 0x127   : > { %v1187_v61 = vmax.f32 %v1123_v55, 0.0  ;;  %v1203_v62 = vmax.f32 %v1139_v56, 0.0 }
 0x128   : > { %v1156_v63 = vmax.f32 %v1092_v59, 0.0  ;;  %v1172_v0 = vmax.f32 %v1108_v60, 0.0 }
 0x129   : > { %1251 = vst [vmem:[%s2056_s27 + $0x158] sm:$0xff] %v1187_v61 }
 0x12a   : > { %1267 = vst [vmem:[%s2056_s27 + $0x1d8] sm:$0xff] %v1203_v62 }
 0x12b   : > { %1220 = vst [vmem:[%s2056_s27 + $0x60] sm:$0xff] %v1156_v63 }
 0x12c   : > { %1236 = vst [vmem:[%s2056_s27 + $0xe0] sm:$0xff] %v1172_v0  ;;  %v831_v1 = vpop.f32.mrf.mxu2  ;;  %v871_v2 = vpop.f32.mrf.mxu3 }
 0x12d   : > { %v1124_v3 = vadd.f32 %v2051_v40, %v831_v1  ;;  %v1140_v4 = vadd.f32 %v2051_v40, %v871_v2  ;;  %v753_v5 = vpop.f32.mrf.mxu0  ;;  %v793_v6 = vpop.f32.mrf.mxu1 }
 0x12e   : > { %v1093_v7 = vadd.f32 %v2051_v40, %v753_v5  ;;  %v1109_v8 = vadd.f32 %v2051_v40, %v793_v6 }
 0x12f   : > { %v1188_v9 = vmax.f32 %v1124_v3, 0.0  ;;  %v1204_v10 = vmax.f32 %v1140_v4, 0.0 }
 0x130   : > { %v1157_v11 = vmax.f32 %v1093_v7, 0.0  ;;  %v1173_v12 = vmax.f32 %v1109_v8, 0.0 }
 0x131   : > { %1252 = vst [vmem:[%s2056_s27 + $0x160] sm:$0xff] %v1188_v9 }
 0x132   : > { %1268 = vst [vmem:[%s2056_s27 + $0x1e0] sm:$0xff] %v1204_v10 }
 0x133   : > { %1221 = vst [vmem:[%s2056_s27 + $0x68] sm:$0xff] %v1157_v11 }
 0x134   : > { %1237 = vst [vmem:[%s2056_s27 + $0xe8] sm:$0xff] %v1173_v12  ;;  %v833_v13 = vpop.f32.mrf.mxu2  ;;  %v873_v14 = vpop.f32.mrf.mxu3 }
 0x135   : > { %v1125_v15 = vadd.f32 %v2051_v40, %v833_v13  ;;  %v1141_v16 = vadd.f32 %v2051_v40, %v873_v14  ;;  %v756_v17 = vpop.f32.mrf.mxu0  ;;  %v796_v18 = vpop.f32.mrf.mxu1 }
 0x136   : > { %v1094_v19 = vadd.f32 %v2051_v40, %v756_v17  ;;  %v1110_v20 = vadd.f32 %v2051_v40, %v796_v18 }
 0x137   : > { %v1189_v21 = vmax.f32 %v1125_v15, 0.0  ;;  %v1205_v22 = vmax.f32 %v1141_v16, 0.0 }
 0x138   : > { %v1158_v23 = vmax.f32 %v1094_v19, 0.0  ;;  %v1174_v24 = vmax.f32 %v1110_v20, 0.0 }
 0x139   : > { %1253 = vst [vmem:[%s2056_s27 + $0x168] sm:$0xff] %v1189_v21 }
 0x13a   : > { %1269 = vst [vmem:[%s2056_s27 + $0x1e8] sm:$0xff] %v1205_v22 }
 0x13b   : > { %1222 = vst [vmem:[%s2056_s27 + $0x70] sm:$0xff] %v1158_v23 }
 0x13c   : > { %1238 = vst [vmem:[%s2056_s27 + $0xf0] sm:$0xff] %v1174_v24  ;;  %v836_v25 = vpop.f32.mrf.mxu2  ;;  %v876_v26 = vpop.f32.mrf.mxu3 }
 0x13d   : > { %v1126_v27 = vadd.f32 %v2051_v40, %v836_v25  ;;  %v1142_v28 = vadd.f32 %v2051_v40, %v876_v26  ;;  %v758_v29 = vpop.f32.mrf.mxu0  ;;  %v798_v30 = vpop.f32.mrf.mxu1 }
 0x13e   : > { %v1095_v31 = vadd.f32 %v2051_v40, %v758_v29  ;;  %v1111_v32 = vadd.f32 %v2051_v40, %v798_v30 }
 0x13f   : > { %v1190_v33 = vmax.f32 %v1126_v27, 0.0  ;;  %v1206_v34 = vmax.f32 %v1142_v28, 0.0 }
 0x140   : > { %v1159_v35 = vmax.f32 %v1095_v31, 0.0  ;;  %v1175_v36 = vmax.f32 %v1111_v32, 0.0 }
 0x141   : > { %1254 = vst [vmem:[%s2056_s27 + $0x170] sm:$0xff] %v1190_v33 }
 0x142   : > { %1270 = vst [vmem:[%s2056_s27 + $0x1f0] sm:$0xff] %v1206_v34 }
 0x143   : > { %1223 = vst [vmem:[%s2056_s27 + $0x78] sm:$0xff] %v1159_v35 }
 0x144   : > { %1239 = vst [vmem:[%s2056_s27 + $0xf8] sm:$0xff] %v1175_v36  ;;  %v838_v37 = vpop.f32.mrf.mxu2  ;;  %v878_v38 = vpop.f32.mrf.mxu3 }
 0x145   : > { %v1127_v39 = vadd.f32 %v2051_v40, %v838_v37  ;;  %v1143_v41 = vadd.f32 %v2051_v40, %v878_v38 }
 0x147   : > { %v1191_v42 = vmax.f32 %v1127_v39, 0.0  ;;  %v1207_v43 = vmax.f32 %v1143_v41, 0.0 }
 0x149   : > { %1255 = vst [vmem:[%s2056_s27 + $0x178] sm:$0xff] %v1191_v42 }
 0x14a   : > { %1271 = vst [vmem:[%s2056_s27 + $0x1f8] sm:$0xff] %v1207_v43 }
 0x14b   : > { %1812 = shalt.err (!%p1809_p12)
}
 0x14c   : > { %s1876_s6 = smov 128   ;;  %s1877_s1 = smov 8  }
 0x14d   : > { %1653 = dma.vmem_to_hbm [thread:$0]  (%p1979_p3), %s1287_s24, 8192, %s1289_s15, %s1273_s25, %s1876_s6, %s1876_s6, %s1877_s1  }
 0x14e PF: > { %p1670_p13 = scmp.ge.s32.totalorder %s1871_s17, 2  ;;  %s1303_s20 = sand.u32 1, %s1851_s12  }
 0x14f   : > { %s1304_s22 = scalar_lea.sflag [#allocation5], %s1303_s20 }
 0x150   : > { %p1664_p0 = pnand %p1670_p13, %p1947_p6 }
 0x152   : > { %p1665_p5 = pneg %p1664_p0 }
 0x154   : > { %1846 = dma.done.wait (%p1665_p5), %s1304_s22, 8192  }
 0x155   : > { %1848 = vsyncadd (%p1665_p5), %s1304_s22, 4294959104  ;;  %s20_s17 = sadd.s32 1, %s1871_s17   ;;  %s2237_s12 = smov %s1855_s13 }
 0x156   : > { %p17_p7 = scmp.ge.s32.totalorder %s20_s17, 6   ;;  %s2238_s13 = smov %s1859_s14 }
 0x157   : > { %s2239_s14 = smov %s1988_s18  ;;  %s2240_s15 = smov %s1867_s16 }
 0x158   : > { %s2241_s16 = smov %s2243_s5  ;;  %19 = sbr.rel (!%p17_p7) target bundleno = 9 (0x9), region = 93 }
 0x15d   :  { %1310 = vsyncpa [#allocation4], 1 }
 0x15e   :  { %1312 = vsyncpa [#allocation4 + $0x1], 1 }
 0x15f   :  { %1313 = vsyncpa [#allocation7], 1 }
 0x160   :  { %1314 = vsyncpa [#allocation5], 1 }
 0x161   :  { %1316 = vsyncpa [#allocation5 + $0x1], 1 }

</bundles_post_ra>
